<compile_context>
chip_gen: v5e
topology: v5e:2x2
jax: 0.10.0
libtpu: 0.0.40
codegen_flags: <defaults>
</compile_context>

<pallas_src>
import functools

import jax
import jax.numpy as jnp
from jax import lax
from jax.experimental import pallas as pl
from jax.experimental.pallas import tpu as pltpu

NEG = -1e9  # "minus infinity" for padded tag columns (finite to avoid NaNs in logsumexp)


def _round_up(n, m):
    return ((n + m - 1) // m) * m


# ----------------------------------------------------------------------------
# Kernel 1: emissions = LayerNorm(Linear(x)), lane-dense padded output
# ----------------------------------------------------------------------------
def _linear_ln_kernel(x_ref, w_ref, b_ref, g_ref, beta_ref, o_ref, *, n_real):
    # x_ref: (tile, 32) | w_ref: (32, KL) | b/g/beta: (1, KL) | o_ref: (tile, KL)
    y = jnp.dot(x_ref[...], w_ref[...], preferred_element_type=jnp.float32) + b_ref[...]
    KL = y.shape[-1]
    col = lax.broadcasted_iota(jnp.int32, (1, KL), 1)
    valid = (col < n_real).astype(jnp.float32)          # LN stats over the real K columns only
    inv_n = 1.0 / float(n_real)
    mu = jnp.sum(y * valid, axis=-1, keepdims=True) * inv_n
    d = (y - mu) * valid
    var = jnp.sum(d * d, axis=-1, keepdims=True) * inv_n   # biased, like torch LayerNorm
    # padded columns: gamma=0, beta=NEG  ->  emission = NEG (excluded from CRF automatically)
    o_ref[...] = (y - mu) * lax.rsqrt(var + 1e-5) * g_ref[...] + beta_ref[...]


def linear_layernorm(x2d, w_p, b_p, g_p, beta_p, *, n_real, tile):
    N, H = x2d.shape
    KL = w_p.shape[1]
    return pl.pallas_call(
        functools.partial(_linear_ln_kernel, n_real=n_real),
        out_shape=jax.ShapeDtypeStruct((N, KL), jnp.float32),
        grid=(N // tile,),
        in_specs=[
            pl.BlockSpec((tile, H), lambda i: (i, 0)),
            pl.BlockSpec((H, KL), lambda i: (0, 0)),
            pl.BlockSpec((1, KL), lambda i: (0, 0)),
            pl.BlockSpec((1, KL), lambda i: (0, 0)),
            pl.BlockSpec((1, KL), lambda i: (0, 0)),
        ],
        out_specs=pl.BlockSpec((tile, KL), lambda i: (i, 0)),
        compiler_params=pltpu.CompilerParams(dimension_semantics=("parallel",)),
    )(x2d, w_p, b_p, g_p, beta_p)


# ----------------------------------------------------------------------------
# Kernel 2: fused CRF (negative log-likelihood + full-length Viterbi decode)
#   emissions (T, Kp, B): batch on lanes, padded tag axis (Kp = round_up(K,8)) on sublanes.
# ----------------------------------------------------------------------------
def _crf_fused_kernel(em_ref, tags_ref, mask_ref, start_ref, end_ref, trans_ref,
                      nll_ref, path_ref, hist_ref, *, unroll):
    T, Kp, Bb = em_ref.shape
    f32 = jnp.float32

    trans = trans_ref[...]                    # (Kp, Kp)
    trans_b = trans[:, :, None]               # hoisted broadcast, reused every step
    start = start_ref[...]                    # (Kp, 1)
    end = end_ref[...]                        # (Kp, 1)

    k_iota2 = lax.broadcasted_iota(jnp.int32, (Kp, Bb), 0)       # hoisted out of the loops
    i_iota3 = lax.broadcasted_iota(jnp.int32, (Kp, Kp, Bb), 0)   # hoisted out of the loops

    e0 = em_ref[0]                                               # (Kp, Bb)
    tags0 = tags_ref[pl.ds(0, 1), :]                             # (1, Bb) i32
    oh0 = (k_iota2 == tags0).astype(f32)                         # (Kp, Bb)

    alpha0 = start + e0                                          # (Kp, Bb)
    numer0 = jnp.sum(alpha0 * oh0, axis=0, keepdims=True)        # start[tag0] + em[0, tag0]

    def step(t, carry):
        alpha, vscore, numer, oh_prev = carry
        e_t = em_ref[t]                                          # (Kp, Bb)
        m_t = mask_ref[pl.ds(t, 1), :]                           # (1, Bb)
        tg_t = tags_ref[pl.ds(t, 1), :]                          # (1, Bb)
        oh_t = (k_iota2 == tg_t).astype(f32)                     # (Kp, Bb)

        # ---- gold-path score increment: (trans[tag_{t-1}, tag_t] + em[t, tag_t]) * mask[t] ----
        tr_row = jnp.sum(trans_b * oh_prev[:, None, :], axis=0)  # (Kp, Bb): trans[tag_{t-1}, j]
        sc = jnp.sum((tr_row + e_t) * oh_t, axis=0, keepdims=True)   # (1, Bb)
        numer = numer + sc * m_t

        # ---- shared broadcast for both recursions: trans[i, j] + em[t, j, b] ----
        te = trans_b + e_t[None, :, :]                           # (Kp, Kp, Bb)

        # ---- forward algorithm: logsumexp over previous tag i (axis 0, element-wise VPU) ----
        bcf = alpha[:, None, :] + te
        mxf = jnp.max(bcf, axis=0)                               # (Kp, Bb)
        nf = jnp.log(jnp.sum(jnp.exp(bcf - mxf[None, :, :]), axis=0)) + mxf
        alpha = jnp.where(m_t > 0.5, nf, alpha)

        # ---- Viterbi: max / first-argmax over previous tag i (no mask: crf.decode(x)) ----
        bcv = vscore[:, None, :] + te
        mxv = jnp.max(bcv, axis=0)                               # (Kp, Bb)
        bp = jnp.min(jnp.where(bcv == mxv[None, :, :], i_iota3, Kp), axis=0)   # (Kp, Bb) i32
        hist_ref[t] = bp
        return alpha, mxv, numer, oh_t

    alpha, vscore, numer, _ = lax.fori_loop(
        1, T, step, (alpha0, alpha0, numer0, oh0), unroll=unroll)

    # ---- end-transition score of the gold path (tag at the last unmasked step) ----
    mask_all = mask_ref[...]                                     # (T, Bb)
    tags_all = tags_ref[...]                                     # (T, Bb)
    seq_end = jnp.sum(mask_all, axis=0, keepdims=True) - 1.0     # (1, Bb)
    t_iota = lax.broadcasted_iota(jnp.int32, (T, Bb), 0).astype(f32)
    is_last = (t_iota == seq_end).astype(f32)                    # (T, Bb)
    last_tag = jnp.sum(tags_all.astype(f32) * is_last, axis=0, keepdims=True)  # (1, Bb)
    end_oh = (k_iota2.astype(f32) == last_tag).astype(f32)       # (Kp, Bb)
    end_sc = jnp.sum(end * end_oh, axis=0, keepdims=True)        # (1, Bb)
    numer = numer + end_sc

    # ---- log-partition (denominator) ----
    fin = alpha + end                                            # (Kp, Bb)
    mx = jnp.max(fin, axis=0, keepdims=True)
    denom = jnp.log(jnp.sum(jnp.exp(fin - mx), axis=0, keepdims=True)) + mx

    nll_ref[...] = denom - numer                                 # per-sequence -llh, (1, Bb)

    # ---- Viterbi termination + backtrace (lane-dense (T, Bb) path output) ----
    finv = vscore + end
    mxv = jnp.max(finv, axis=0, keepdims=True)
    best = jnp.min(jnp.where(finv == mxv, k_iota2.astype(f32), float(Kp)),
                   axis=0, keepdims=True).astype(jnp.int32)      # (1, Bb)
    path_ref[pl.ds(T - 1, 1), :] = best

    def bwd(i, cur):
        t = T - 2 - i
        h = hist_ref[t + 1]                                      # (Kp, Bb) i32
        sel = (k_iota2 == cur)                                   # (Kp, Bb)
        nxt = jnp.sum(jnp.where(sel, h.astype(f32), 0.0),
                      axis=0, keepdims=True).astype(jnp.int32)   # h[tag_cur[b], b]
        path_ref[pl.ds(t, 1), :] = nxt
        return nxt

    lax.fori_loop(0, T - 1, bwd, best, unroll=unroll)


def crf_fused(em_t, tags_t, mask_t, start_c, end_c, trans_p, *, b_blk, unroll):
    T, Kp, Bp = em_t.shape
    return pl.pallas_call(
        functools.partial(_crf_fused_kernel, unroll=unroll),
        out_shape=(jax.ShapeDtypeStruct((1, Bp), jnp.float32),
                   jax.ShapeDtypeStruct((T, Bp), jnp.int32)),
        grid=(Bp // b_blk,),
        in_specs=[
            pl.BlockSpec((T, Kp, b_blk), lambda i: (0, 0, i)),
            pl.BlockSpec((T, b_blk), lambda i: (0, i)),
            pl.BlockSpec((T, b_blk), lambda i: (0, i)),
            pl.BlockSpec((Kp, 1), lambda i: (0, 0)),
            pl.BlockSpec((Kp, 1), lambda i: (0, 0)),
            pl.BlockSpec((Kp, Kp), lambda i: (0, 0)),
        ],
        out_specs=(pl.BlockSpec((1, b_blk), lambda i: (0, i)),
                   pl.BlockSpec((T, b_blk), lambda i: (0, i))),
        scratch_shapes=[pltpu.VMEM((T, Kp, b_blk), jnp.int32)],   # Viterbi backpointers
        compiler_params=pltpu.CompilerParams(dimension_semantics=("parallel",)),
    )(em_t, tags_t, mask_t, start_c, end_c, trans_p)


# ----------------------------------------------------------------------------
# TaskHead forward (glue in plain JAX)
# ----------------------------------------------------------------------------
def task_head_forward(params, x, labels, attention_mask):
    # x: (B,T,32) f32 | labels: (B,T) int | attention_mask: (B,T) {0,1}
    B, T, H = x.shape
    K = params["w"].shape[1]           # n_labels + 1
    Kp = _round_up(K, 8)               # CRF tag axis padded to a sublane multiple
    KL = _round_up(K, 128)             # lane-dense emission width for kernel 1

    # ---- emissions = LayerNorm(Linear(x)) over flattened rows, big row tiles ----
    N = B * T
    tile = 256 if N >= 256 else _round_up(N, 8)
    N_pad = _round_up(N, tile)
    x2d = x.reshape(N, H)
    if N_pad != N:
        x2d = jnp.pad(x2d, ((0, N_pad - N), (0, 0)))

    padK = KL - K
    w_p = jnp.pad(params["w"], ((0, 0), (0, padK)))
    b_p = jnp.pad(params["b"], ((0, 0), (0, padK)))
    g_p = jnp.pad(params["gamma"], ((0, 0), (0, padK)))                         # gamma pad = 0
    beta_p = jnp.pad(params["beta"], ((0, 0), (0, padK)), constant_values=NEG)  # beta pad = NEG
    em2d = linear_layernorm(x2d, w_p, b_p, g_p, beta_p, n_real=K, tile=tile)    # (N_pad, KL)

    # ---- CRF inputs: time-major, tag axis on sublanes, batch on lanes ----
    if B <= 128:
        b_blk = _round_up(B, 8)
        B_pad = b_blk
    else:
        b_blk = 128
        B_pad = _round_up(B, 128)

    em = em2d[:N, :Kp].reshape(B, T, Kp)                     # padded tag columns are NEG
    em_t = jnp.transpose(em, (1, 2, 0))                      # (T, Kp, B)
    em_t = jnp.pad(em_t, ((0, 0), (0, 0), (0, B_pad - B)))
    tags_t = jnp.pad(jnp.transpose(labels.astype(jnp.int32), (1, 0)),
                     ((0, 0), (0, B_pad - B)))
    mask_t = jnp.pad(jnp.transpose(attention_mask.astype(jnp.float32), (1, 0)),
                     ((0, 0), (0, B_pad - B)))

    padKp = Kp - K
    start_c = jnp.pad(params["start"].reshape(K, 1), ((0, padKp), (0, 0)))
    end_c = jnp.pad(params["end"].reshape(K, 1), ((0, padKp), (0, 0)))
    trans_p = jnp.pad(params["trans"], ((0, padKp), (0, padKp)))

    unroll = True if T <= 64 else 8
    nll, path_t = crf_fused(em_t, tags_t, mask_t, start_c, end_c, trans_p,
                            b_blk=b_blk, unroll=unroll)
    loss = jnp.sum(nll[0, :B])                               # torchcrf reduction='sum'
    # TODO(synk): torch returns the decoded path as int64 (.long()); JAX default here is int32.
    path = jnp.transpose(path_t[:, :B], (1, 0))              # (B, T) int32
    return loss, path


# ----------------------------------------------------------------------------
# Pure-JAX reference (torchcrf semantics) for validation
# ----------------------------------------------------------------------------
def ref_forward(params, x, labels, attention_mask):
    w, b = params["w"], params["b"][0]
    gamma, beta = params["gamma"][0], params["beta"][0]
    start, end, trans = params["start"][0], params["end"][0], params["trans"]
    y = x @ w + b
    mu = y.mean(-1, keepdims=True)
    var = ((y - mu) ** 2).mean(-1, keepdims=True)
    em = (y - mu) / jnp.sqrt(var + 1e-5) * gamma + beta                # (B,T,K)
    B, T, K = em.shape
    m = attention_mask.astype(jnp.float32)
    tags = labels.astype(jnp.int32)
    bidx = jnp.arange(B)

    score = start[tags[:, 0]] + em[bidx, 0, tags[:, 0]]
    for t in range(1, T):
        score = score + (trans[tags[:, t - 1], tags[:, t]] + em[bidx, t, tags[:, t]]) * m[:, t]
    seq_end = m.sum(1).astype(jnp.int32) - 1
    score = score + end[tags[bidx, seq_end]]

    alpha = start[None] + em[:, 0]
    for t in range(1, T):
        nxt = jax.nn.logsumexp(alpha[:, :, None] + trans[None] + em[:, t][:, None, :], axis=1)
        alpha = jnp.where(m[:, t][:, None] > 0, nxt, alpha)
    denom = jax.nn.logsumexp(alpha + end[None], axis=1)
    loss = jnp.sum(denom - score)

    vscore = start[None] + em[:, 0]
    hist = []
    for t in range(1, T):
        bc = vscore[:, :, None] + trans[None] + em[:, t][:, None, :]
        hist.append(jnp.argmax(bc, axis=1))
        vscore = jnp.max(bc, axis=1)
    vscore = vscore + end[None]
    last = jnp.argmax(vscore, axis=1)
    rev = [last]
    for h in reversed(hist):
        last = h[bidx, rev[-1]]
        rev.append(last)
    path = jnp.stack(rev[::-1], axis=1)
    return loss, path


if __name__ == "__main__":
    B, T, H = 2, 8, 32
    n_labels = 4
    K = n_labels + 1

    key = jax.random.PRNGKey(0)
    keys = jax.random.split(key, 9)
    params = {
        "w": 0.3 * jax.random.normal(keys[0], (H, K), jnp.float32),   # (in, out) = W^T of torch
        "b": 0.1 * jax.random.normal(keys[1], (1, K), jnp.float32),
        "gamma": 1.0 + 0.1 * jax.random.normal(keys[2], (1, K), jnp.float32),
        "beta": 0.1 * jax.random.normal(keys[3], (1, K), jnp.float32),
        "start": jax.random.uniform(keys[4], (1, K), jnp.float32, -0.1, 0.1),
        "end": jax.random.uniform(keys[5], (1, K), jnp.float32, -0.1, 0.1),
        "trans": jax.random.uniform(keys[6], (K, K), jnp.float32, -0.1, 0.1),
    }

    x = jax.random.normal(keys[7], (B, T, H), jnp.float32)
    labels = jax.random.randint(keys[8], (B, T), 0, K, jnp.int32)
    attention_mask = jnp.array([[1, 1, 1, 1, 1, 1, 1, 1],
                                [1, 1, 1, 1, 1, 1, 0, 0]], jnp.int32)

    loss, path = task_head_forward(params, x, labels, attention_mask)
    jax.block_until_ready((loss, path))

    ref_loss, ref_path = ref_forward(params, x, labels, attention_mask)
    assert jnp.isfinite(loss), "loss not finite"
    assert jnp.allclose(loss, ref_loss, atol=1e-3, rtol=1e-4), (loss, ref_loss)
    assert jnp.array_equal(path, ref_path), (path, ref_path)

    print("KERNEL_OK")
</pallas_src>

<mosaic_0001>
module attributes {stable_mosaic.version = 11 : i64} {
  func.func @_linear_ln_kernel(%arg0: i32, %arg1: memref<16x32xf32, #tpu.memory_space<vmem>>, %arg2: memref<32x128xf32, #tpu.memory_space<vmem>>, %arg3: memref<1x128xf32, #tpu.memory_space<vmem>>, %arg4: memref<1x128xf32, #tpu.memory_space<vmem>>, %arg5: memref<1x128xf32, #tpu.memory_space<vmem>>, %arg6: memref<16x128xf32, #tpu.memory_space<vmem>>) attributes {dimension_semantics = [#tpu.dimension_semantics<parallel>], iteration_bounds = array<i64: 1>, scalar_prefetch = 0 : i64, scratch_operands = 0 : i64, tpu.core_type = #tpu.core_type<tc>, window_params = [{transform_indices = @transform_0, window_bounds = array<i64: 16, 32>}, {pipeline_mode = #tpu.pipeline_mode<synchronous>, transform_indices = @transform_1, window_bounds = array<i64: 32, 128>}, {pipeline_mode = #tpu.pipeline_mode<synchronous>, transform_indices = @transform_2, window_bounds = array<i64: 1, 128>}, {pipeline_mode = #tpu.pipeline_mode<synchronous>, transform_indices = @transform_3, window_bounds = array<i64: 1, 128>}, {pipeline_mode = #tpu.pipeline_mode<synchronous>, transform_indices = @transform_4, window_bounds = array<i64: 1, 128>}, {transform_indices = @transform_5, window_bounds = array<i64: 16, 128>}]} {
    %c0 = arith.constant 0 : index
    %c0_0 = arith.constant 0 : index
    %0 = vector.load %arg1[%c0, %c0_0] : memref<16x32xf32, #tpu.memory_space<vmem>>, vector<16x32xf32>
    %c0_1 = arith.constant 0 : index
    %c0_2 = arith.constant 0 : index
    %1 = vector.load %arg2[%c0_1, %c0_2] : memref<32x128xf32, #tpu.memory_space<vmem>>, vector<32x128xf32>
    %cst = arith.constant dense<0.000000e+00> : vector<16x128xf32>
    %2 = tpu.matmul %0, %1, %cst {dimension_numbers = #tpu.dot_dimension_numbers<[1], [0], [0], [1], [0, 0, 1, 1], [], []>} : vector<16x32xf32>, vector<32x128xf32>, vector<16x128xf32> -> vector<16x128xf32>
    %c0_3 = arith.constant 0 : index
    %c0_4 = arith.constant 0 : index
    %3 = vector.load %arg3[%c0_3, %c0_4] : memref<1x128xf32, #tpu.memory_space<vmem>>, vector<1x128xf32>
    %4 = vector.broadcast %3 : vector<1x128xf32> to vector<16x128xf32>
    %5 = arith.addf %2, %4 : vector<16x128xf32>
    %6 = tpu.iota {dimensions = array<i32: 1>} : vector<1x128xi32>
    %c5_i32 = arith.constant 5 : i32
    %7 = vector.broadcast %c5_i32 : i32 to vector<1x128xi32>
    %8 = arith.cmpi slt, %6, %7 : vector<1x128xi32>
    %9 = arith.extui %8 : vector<1x128xi1> to vector<1x128xi32>
    %10 = arith.sitofp %9 : vector<1x128xi32> to vector<1x128xf32>
    %11 = vector.broadcast %10 : vector<1x128xf32> to vector<16x128xf32>
    %12 = arith.mulf %5, %11 : vector<16x128xf32>
    %cst_5 = arith.constant dense<0.000000e+00> : vector<16xf32>
    %13 = vector.multi_reduction <add>, %12, %cst_5 [1] : vector<16x128xf32> to vector<16xf32>
    %14 = vector.shape_cast %13 : vector<16xf32> to vector<16x1xf32>
    %cst_6 = arith.constant 2.000000e-01 : f32
    %15 = vector.broadcast %cst_6 : f32 to vector<16x1xf32>
    %16 = arith.mulf %14, %15 : vector<16x1xf32>
    %17 = vector.broadcast %16 : vector<16x1xf32> to vector<16x128xf32>
    %18 = arith.subf %5, %17 : vector<16x128xf32>
    %19 = vector.broadcast %10 : vector<1x128xf32> to vector<16x128xf32>
    %20 = arith.mulf %18, %19 : vector<16x128xf32>
    %21 = arith.mulf %20, %20 : vector<16x128xf32>
    %cst_7 = arith.constant dense<0.000000e+00> : vector<16xf32>
    %22 = vector.multi_reduction <add>, %21, %cst_7 [1] : vector<16x128xf32> to vector<16xf32>
    %23 = vector.shape_cast %22 : vector<16xf32> to vector<16x1xf32>
    %cst_8 = arith.constant 2.000000e-01 : f32
    %24 = vector.broadcast %cst_8 : f32 to vector<16x1xf32>
    %25 = arith.mulf %23, %24 : vector<16x1xf32>
    %26 = vector.broadcast %16 : vector<16x1xf32> to vector<16x128xf32>
    %27 = arith.subf %5, %26 : vector<16x128xf32>
    %cst_9 = arith.constant 9.99999974E-6 : f32
    %28 = vector.broadcast %cst_9 : f32 to vector<16x1xf32>
    %29 = arith.addf %25, %28 : vector<16x1xf32>
    %30 = math.rsqrt %29 : vector<16x1xf32>
    %31 = vector.broadcast %30 : vector<16x1xf32> to vector<16x128xf32>
    %32 = arith.mulf %27, %31 : vector<16x128xf32>
    %c0_10 = arith.constant 0 : index
    %c0_11 = arith.constant 0 : index
    %33 = vector.load %arg4[%c0_10, %c0_11] : memref<1x128xf32, #tpu.memory_space<vmem>>, vector<1x128xf32>
    %34 = vector.broadcast %33 : vector<1x128xf32> to vector<16x128xf32>
    %35 = arith.mulf %32, %34 : vector<16x128xf32>
    %c0_12 = arith.constant 0 : index
    %c0_13 = arith.constant 0 : index
    %36 = vector.load %arg5[%c0_12, %c0_13] : memref<1x128xf32, #tpu.memory_space<vmem>>, vector<1x128xf32>
    %37 = vector.broadcast %36 : vector<1x128xf32> to vector<16x128xf32>
    %38 = arith.addf %35, %37 : vector<16x128xf32>
    %c0_14 = arith.constant 0 : index
    %c0_15 = arith.constant 0 : index
    %39 = vector.load %arg6[%c0_14, %c0_15] : memref<16x128xf32, #tpu.memory_space<vmem>>, vector<16x128xf32>
    tpu.vector_store %arg6[%c0_14, %c0_15], %38 {strides = array<i32>} : memref<16x128xf32, #tpu.memory_space<vmem>>, vector<16x128xf32>,
    return
  }
  func.func @transform_0(%arg0: i32) -> (i32, i32) {
    %c0_i32 = arith.constant 0 : i32
    %c0_i32_0 = arith.constant 0 : i32
    return %arg0, %c0_i32 : i32, i32
  }
  func.func @transform_1(%arg0: i32) -> (i32, i32) {
    %c0_i32 = arith.constant 0 : i32
    %c0_i32_0 = arith.constant 0 : i32
    %c0_i32_1 = arith.constant 0 : i32
    return %c0_i32, %c0_i32_0 : i32, i32
  }
  func.func @transform_2(%arg0: i32) -> (i32, i32) {
    %c0_i32 = arith.constant 0 : i32
    %c0_i32_0 = arith.constant 0 : i32
    %c0_i32_1 = arith.constant 0 : i32
    return %c0_i32, %c0_i32_0 : i32, i32
  }
  func.func @transform_3(%arg0: i32) -> (i32, i32) {
    %c0_i32 = arith.constant 0 : i32
    %c0_i32_0 = arith.constant 0 : i32
    %c0_i32_1 = arith.constant 0 : i32
    return %c0_i32, %c0_i32_0 : i32, i32
  }
  func.func @transform_4(%arg0: i32) -> (i32, i32) {
    %c0_i32 = arith.constant 0 : i32
    %c0_i32_0 = arith.constant 0 : i32
    %c0_i32_1 = arith.constant 0 : i32
    return %c0_i32, %c0_i32_0 : i32, i32
  }
  func.func @transform_5(%arg0: i32) -> (i32, i32) {
    %c0_i32 = arith.constant 0 : i32
    %c0_i32_0 = arith.constant 0 : i32
    return %arg0, %c0_i32 : i32, i32
  }
}

</mosaic_0001>

<bundles_post_ra>
// kernel: tpu_custom_call.1
= control target key start
LH: loop header
LB: loop body
LE: loop exit
PB: predicated region body
PF: predicated region fallthrough
CT: control target
= control target key end

     0   :  { %10 = vsyncpa [#allocation3], 0  ;;  %s337_s0 = inlined_call_operand.hbm [shape: f32[16,32], index: 0, kind: input, shape index: {}]   ;;  %s338_s1 = inlined_call_operand.hbm [shape: f32[32,128], index: 1, kind: input, shape index: {}]   ;;  %s339_s2 = inlined_call_operand.vmem [shape: f32[1,128], index: 2, kind: input, shape index: {}]   ;;  %s340_s3 = inlined_call_operand.vmem [shape: f32[1,128], index: 3, kind: input, shape index: {}]   ;;  %s341_s4 = inlined_call_operand.vmem [shape: f32[1,128], index: 4, kind: input, shape index: {}]   ;;  %s342_s5 = inlined_call_operand.hbm [shape: f32[16,128], index: 5, kind: output, shape index: {}]  }
   0x1   :  { %11 = vsyncpa [#allocation6], 0 }
   0x2   :  { %12 = vsyncpa [#allocation4], 0  ;;  %s17_s20 = sshll.u32 %s337_s0, 4  ;;  %s274_s21 = smov [#allocation2]   ;;  %s18_s20 = int_to_ptr.hbm [resolvable:$true] %s17_s20 }
   0x3   :  { %s19_s22 = sshll.u32 %s274_s21, 4  ;;  %s30_s25 = sshll.u32 %s338_s1, 4  ;;  %s20_s22 = int_to_ptr.vmem [resolvable:$true] %s19_s22  ;;  %s31_s25 = int_to_ptr.hbm [resolvable:$true] %s30_s25 }
   0x4   :  { %s275_s26 = smov 128   ;;  %s276_s27 = smov 8  }
   0x5   :  { %25 = dma.hbm_to_vmem [thread:$0]  %s18_s20, 256, %s20_s22, [#allocation3], %s275_s26, %s275_s26, %s276_s27  }
   0x6   :  { %s277_s28 = smov [#allocation5]  }
   0x7   :  { %s32_s29 = sshll.u32 %s277_s28, 4  ;;  %s33_s29 = int_to_ptr.vmem [resolvable:$true] %s32_s29 }
   0x8   :  { %38 = dma.hbm_to_vmem [thread:$0]  %s31_s25, 512, %s33_s29, [#allocation6], %s275_s26, %s275_s26, %s276_s27  }
   0x9   :  { %268 = dma.done.wait [#allocation3], 256  }
   0xa   :  { %269 = vsyncadd [#allocation3], 4294967040 }
   0xb   :  { %270 = dma.done.wait [#allocation6], 512  }
   0xc   :  { %271 = vsyncadd [#allocation6], 4294966784  ;;  %v58_v0 = vld [vmem:[#allocation5 + $0x18] sm:$0xff]  ;;  %v57_v1 = vld [vmem:[#allocation5 + $0x10] sm:$0xff]  ;;  %vm63_vm0 = vcmask 261120   ;;  %v93_v6 = vlaneseq  ;;  %v278_v10 = vmov 0.0  }
   0xd   :  { %82 = vmatpush.msra.mxu0 %v58_v0  ;;  %179 = vmatpush.msra.mxu1 %v58_v0  ;;  %v56_v2 = vld [vmem:[#allocation5 + $0x8] sm:$0xff]  ;;  %v55_v3 = vld [vmem:[#allocation5] sm:$0xff]  ;;  %v53_v4 = vld [vmem:[#allocation2] sm:$0xff]  ;;  %s279_s8 = smov [#allocation7]   ;;  %s162_s11 = sshll.u32 %s342_s5, 4  ;;  %s163_s11 = int_to_ptr.hbm [resolvable:$true] %s162_s11 }
   0xe   :  { %v54_v5 = vld [vmem:[#allocation2 + $0x8] sm:$0xff]  ;;  %v94_v7 = vand.u32 127, %v93_v6  ;;  %v189_v8 = vld [vmem:[%s339_s2] ss:$0 sm:$0xff] }
   0xf   :  { %83 = vmatpush.msra.mxu0 %v57_v1  ;;  %180 = vmatpush.msra.mxu1 %v57_v1  ;;  %v190_v41 = vld [vmem:[%s340_s3] ss:$0 sm:$0xff]  ;;  %s160_s3 = sshll.u32 %s279_s8, 4  ;;  %s161_s3 = int_to_ptr.vmem [resolvable:$true] %s160_s3 }
  0x10   :  { %vm95_vm1 = vcmp.lt.s32.totalorder %v94_v7, 5  ;;  %v191_v45 = vld [vmem:[%s341_s4] ss:$0 sm:$0xff] }
  0x11   :  { %84 = vmatpush.msra.mxu0 %v56_v2  ;;  %181 = vmatpush.msra.mxu1 %v56_v2  ;;  %v178_v11 = vsel %vm95_vm1, 1.0, %v278_v10 }
  0x13   :  { %85 = vmatpush.msra.mxu0 %v55_v3  ;;  %182 = vmatpush.msra.mxu1 %v55_v3 }
  0x14   :  { %176 = vmatmul.msk.f32.vlgmr.msra.gmra.mxu0 %vm63_vm0, %v53_v4  ;;  %177 = vmatmul.msk.f32.vlgmr.msra.gmra.mxu1 %vm63_vm0, %v54_v5 }
  0x91   :  { %v87_v9 = vpop.f32.mrf.mxu0  ;;  %v90_v13 = vpop.f32.mrf.mxu1 }
  0x92   :  { %v88_v12 = vadd.f32 %v189_v8, %v87_v9  ;;  %v91_v15 = vadd.f32 %v189_v8, %v90_v13 }
  0x94   :  { %v98_v14 = vmul.f32 %v178_v11, %v88_v12  ;;  %v99_v16 = vmul.f32 %v178_v11, %v91_v15 }
  0x96   :  { %100 = vadd.xlane.f32.xlu0 %v98_v14 }
  0x9e   :  { %102 = vadd.xlane.f32.xlu0 %v99_v16 }
 0x109   :  { %v101_v17 = vpop.xlane.xlu0 %100 }
 0x10a   :  { %v104_v18 = vmul.f32 0.2, %v101_v17 }
 0x10c   :  { %v106_v19 = vsub.f32 %v88_v12, %v104_v18 }
 0x10e   :  { %v108_v20 = vmul.f32 %v178_v11, %v106_v19 }
 0x110   :  { %v110_v21 = vmul.f32 %v108_v20, %v108_v20 }
 0x111   :  { %v103_v22 = vpop.xlane.xlu0 %102 }
 0x112   :  { %v105_v23 = vmul.f32 0.2, %v103_v22  ;;  %112 = vadd.xlane.f32.xlu1 %v110_v21 }
 0x114   :  { %v107_v24 = vsub.f32 %v91_v15, %v105_v23 }
 0x116   :  { %v109_v25 = vmul.f32 %v178_v11, %v107_v24 }
 0x118   :  { %v111_v26 = vmul.f32 %v109_v25, %v109_v25 }
 0x11a   :  { %114 = vadd.xlane.f32.xlu1 %v111_v26 }
 0x185   :  { %v113_v27 = vpop.xlane.xlu1 %112 }
 0x186   :  { %v116_v28 = vmul.f32 0.2, %v113_v27 }
 0x188   :  { %v118_v29 = vadd.f32 1e-05, %v116_v28 }
 0x18a   :  { %192 = vrsqrt.f32 %v118_v29  ;;  %vm126_vm3 = vweird.f32 %v118_v29 }
 0x18d   :  { %v115_v30 = vpop.xlane.xlu1 %114 }
 0x18e   :  { %v117_v31 = vmul.f32 0.2, %v115_v30 }
 0x190   :  { %v193_v32 = vpop.eup %192  ;;  %v119_v33 = vadd.f32 1e-05, %v117_v31 }
 0x191   :  { %v121_v34 = vmul.f32 %v193_v32, %v118_v29  ;;  %vm127_vm2 = vweird.f32 %v193_v32 }
 0x192   :  { %194 = vrsqrt.f32 %v119_v33  ;;  %vm128_vm4 = vmor %vm126_vm3, %vm127_vm2  ;;  %vm136_vm6 = vweird.f32 %v119_v33 }
 0x193   :  { %v122_v35 = vmul.f32 %v193_v32, %v121_v34 }
 0x195   :  { %v123_v36 = vmul.f32 0.5, %v122_v35 }
 0x197   :  { %v124_v37 = vsub.f32 1.5, %v123_v36 }
 0x198   :  { %v195_v38 = vpop.eup %194 }
 0x199   :  { %v125_v39 = vmul.f32 %v193_v32, %v124_v37  ;;  %v131_v40 = vmul.f32 %v195_v38, %v119_v33  ;;  %vm137_vm5 = vweird.f32 %v195_v38 }
 0x19a   :  { %vm138_vm7 = vmor %vm136_vm6, %vm137_vm5 }
 0x19b   :  { %v129_v42 = vsel %vm128_vm4, %v193_v32, %v125_v39  ;;  %v132_v43 = vmul.f32 %v195_v38, %v131_v40 }
 0x19c   :  { %v140_v44 = vmul.f32 %v129_v42, %v106_v19 }
 0x19d   :  { %v133_v46 = vmul.f32 0.5, %v132_v43 }
 0x19e   :  { %v146_v47 = vmul.f32 %v190_v41, %v140_v44 }
 0x19f   :  { %v134_v48 = vsub.f32 1.5, %v133_v46 }
 0x1a0   :  { %v152_v49 = vadd.f32 %v191_v45, %v146_v47 }
 0x1a1   :  { %v135_v50 = vmul.f32 %v195_v38, %v134_v48 }
 0x1a2   :  { %154 = vst [vmem:[#allocation7] sm:$0xff] %v152_v49 }
 0x1a3   :  { %v139_v51 = vsel %vm138_vm7, %v195_v38, %v135_v50 }
 0x1a4   :  { %v141_v52 = vmul.f32 %v139_v51, %v107_v24 }
 0x1a6   :  { %v147_v53 = vmul.f32 %v190_v41, %v141_v52 }
 0x1a8   :  { %v153_v54 = vadd.f32 %v191_v45, %v147_v53 }
 0x1aa   :  { %155 = vst [vmem:[#allocation7 + $0x8] sm:$0xff] %v153_v54 }
 0x1ab   :  { %168 = dma.vmem_to_hbm [thread:$0]  %s161_s3, 256, %s163_s11, [#allocation4], %s275_s26, %s275_s26, %s276_s27  }
 0x1ac   :  { %272 = dma.done.wait [#allocation4], 256  }
 0x1ad   :  { %273 = vsyncadd [#allocation4], 4294967040 }
 0x1ae   :  { %173 = vsyncpa [#allocation3], 1 }
 0x1af   :  { %174 = vsyncpa [#allocation6], 1 }
 0x1b0   :  { %175 = vsyncpa [#allocation4], 1 }

</bundles_post_ra>
